<compile_context>
chip_gen: v6e
topology: v6e:2x2x1
jax: 0.10.0
libtpu: 0.0.40
codegen_flags: <defaults>
</compile_context>

<pallas_src>
import jax
import jax.numpy as jnp
import numpy as np
from jax.experimental import pallas as pl
from jax.experimental.pallas import tpu as pltpu


# ----------------------------------------------------------------------------
# Fused kernel: GCNConv1 -> ReLU -> (pool-folded) GCNConv2, tiled over nadj.
# Grid = (node-row tiles i, node-col reduction tiles k); k is innermost.
# ----------------------------------------------------------------------------
def _fused_gcn_kernel(nadj_ref, x_ref, w1_ref, b1_ref, padj_ref, w2_ref,
                      b2p_ref, o_ref, agg_ref, pooled_ref):
    i = pl.program_id(0)
    k = pl.program_id(1)
    ni = pl.num_programs(0)
    nk = pl.num_programs(1)

    @pl.when((i == 0) & (k == 0))
    def _():  # zero the resident [G, H] pooled accumulator once
        pooled_ref[...] = jnp.zeros_like(pooled_ref)

    @pl.when(k == 0)
    def _():  # zero the per-row-tile conv1 aggregation accumulator
        agg_ref[...] = jnp.zeros_like(agg_ref)

    # conv1 aggregation partial sum: nadj[i, k] @ x[k]  ->  f32 [tm, Cin].
    # nadj and x share adj_dtype (f32 or bf16, cast once on the host).
    agg_ref[...] += jnp.dot(nadj_ref[...], x_ref[...],
                            preferred_element_type=jnp.float32)

    @pl.when(k == nk - 1)
    def _():
        # conv1 linear + bias + ReLU (dropout p=0.5 is identity in eval mode).
        h = jnp.dot(agg_ref[...].astype(w1_ref.dtype), w1_ref[...],
                    preferred_element_type=jnp.float32) + b1_ref[...]
        h = jnp.maximum(h, 0.0)                                   # [tm, H] f32
        # conv2 aggregation folded with sum-pooling: pooled_adj[:, i] @ h.
        pooled_ref[...] += jnp.dot(padj_ref[...], h.astype(padj_ref.dtype),
                                   preferred_element_type=jnp.float32)

    @pl.when((i == ni - 1) & (k == nk - 1))
    def _():
        # conv2 linear; the pooled bias term (cnt * b2) was precomputed
        # host-side (sum-pool identity:  P @ (M@W2 + b2) == (P@M)@W2 + cnt*b2).
        o_ref[...] = (jnp.dot(pooled_ref[...].astype(w2_ref.dtype), w2_ref[...],
                              preferred_element_type=jnp.float32)
                      + b2p_ref[...]).astype(o_ref.dtype)


def _pick_tile(n, pref=256):
    # MXU-friendly tile (multiple of 256 on v6e/v7x; 128 also fine on v5e);
    # fall back to the full extent for demo-sized / non-divisible N.
    # TODO(synk): pad N to a tile multiple for fully general sizes.
    return pref if (n >= pref and n % pref == 0) else n


def gcn_with_pooling_pallas(nadj, x, w1, b1, pooled_adj, w2, b2p,
                            *, tm=None, tk=None, vmem_limit_bytes=32 << 20):
    n = nadj.shape[0]
    cin = x.shape[1]
    hidden = w1.shape[1]
    g, cout = b2p.shape

    tm = _pick_tile(n) if tm is None else tm
    tk = _pick_tile(n) if tk is None else tk
    ni, nk = n // tm, n // tk

    # Deeper prefetch on the single dominant streamed input, only once the
    # reduction loop is long enough to hide HBM latency behind (v7x mainly).
    if nk >= 4:
        nadj_spec = pl.BlockSpec((tm, tk), lambda i, k: (i, k),
                                 pipeline_mode=pl.Buffered(3))
    else:
        nadj_spec = pl.BlockSpec((tm, tk), lambda i, k: (i, k))

    grid_spec = pltpu.PrefetchScalarGridSpec(
        num_scalar_prefetch=0,
        grid=(ni, nk),
        in_specs=[
            nadj_spec,                                          # [N, N] stream
            pl.BlockSpec((tk, cin), lambda i, k: (k, 0)),       # x
            pl.BlockSpec((cin, hidden), lambda i, k: (0, 0)),   # W1 (resident)
            pl.BlockSpec((1, hidden), lambda i, k: (0, 0)),     # b1
            pl.BlockSpec((g, tm), lambda i, k: (0, i)),         # pooled_adj
            pl.BlockSpec((hidden, cout), lambda i, k: (0, 0)),  # W2 (resident)
            pl.BlockSpec((g, cout), lambda i, k: (0, 0)),       # cnt * b2
        ],
        # Single resident output block (written once at the final grid step).
        out_specs=pl.BlockSpec((g, cout), lambda i, k: (0, 0)),
        scratch_shapes=[
            pltpu.VMEM((tm, cin), jnp.float32),    # conv1 aggregation acc
            pltpu.VMEM((g, hidden), jnp.float32),  # pooled feature acc
        ],
    )

    return pl.pallas_call(
        _fused_gcn_kernel,
        out_shape=jax.ShapeDtypeStruct((g, cout), jnp.float32),
        grid_spec=grid_spec,
        compiler_params=pltpu.CompilerParams(
            # Both axes are reductions into persistent accumulators.
            dimension_semantics=("arbitrary", "arbitrary"),
            vmem_limit_bytes=vmem_limit_bytes,
        ),
    )(nadj, x, w1, b1, pooled_adj, w2, b2p)


# ----------------------------------------------------------------------------
# Host-side prep (cheap JAX ops, done once per graph batch)
# ----------------------------------------------------------------------------
def gcn_normalized_adjacency(a):
    # PyG GCNConv default: add self-loops, symmetric normalization.
    n = a.shape[0]
    a_hat = a + jnp.eye(n, dtype=a.dtype)
    deg = jnp.sum(a_hat, axis=1)
    dinv = jax.lax.rsqrt(deg)            # deg >= 1 thanks to self-loops
    return dinv[:, None] * a_hat * dinv[None, :]


def sum_pool_matrix(batch, num_graphs):
    # P[g, n] = 1 if node n belongs to graph g else 0  (global 'sum' pooling).
    return (batch[None, :] == jnp.arange(num_graphs)[:, None]).astype(jnp.float32)


def prepare_inputs(nadj, pool, x, w1, b1, w2, b2, adj_dtype=jnp.float32):
    # Fold pooling into the conv2 aggregation and the node counts into b2
    # (sum-pool only), and cast the streamed operands once on the host.
    pooled_adj = pool @ nadj                              # [G, N]
    cnt = jnp.sum(pool, axis=1, keepdims=True)            # [G, 1]
    b2p = cnt * b2                                        # [G, Cout]
    return (nadj.astype(adj_dtype), x.astype(adj_dtype), w1, b1,
            pooled_adj.astype(adj_dtype), w2, b2p)


def init_linear(key, fan_in, fan_out):
    k1, k2 = jax.random.split(key)
    lim = 1.0 / np.sqrt(fan_in)
    w = jax.random.uniform(k1, (fan_in, fan_out), jnp.float32, -lim, lim)
    b = jax.random.uniform(k2, (1, fan_out), jnp.float32, -lim, lim)
    return w, b


# ----------------------------------------------------------------------------
# Pure-JAX reference (same math, PyG-style op order) for validation.
# ----------------------------------------------------------------------------
def gcn_with_pooling_ref(nadj, pool, x, w1, b1, w2, b2):
    h = nadj @ (x @ w1) + b1          # conv1
    # x_hidden = h  (unused: predictor_type is None)
    h = jnp.maximum(h, 0.0)           # relu (dropouts are identity in eval)
    h = nadj @ (h @ w2) + b2          # conv2
    return pool @ h                   # global sum pooling; Identity predictor


if __name__ == "__main__":
    in_channels = 8
    hidden_channels = 32
    out_channels = 8
    N = 32   # total nodes across the batch
    G = 2    # graphs in the batch
    E = 96   # directed edges

    key = jax.random.PRNGKey(0)
    k_x, k_src, k_dst, k_w1, k_w2 = jax.random.split(key, 5)

    # Node features, random edge_index, batch vector (graph 0: 14, graph 1: 18).
    x0 = jax.random.normal(k_x, (N, in_channels), jnp.float32)
    src = jax.random.randint(k_src, (E,), 0, N)
    dst = jax.random.randint(k_dst, (E,), 0, N)
    batch = jnp.concatenate(
        [jnp.zeros((14,), jnp.int32), jnp.ones((18,), jnp.int32)])

    # Dense adjacency A[dst, src] += 1 (edge_attr=None -> unit edge weights),
    # folded with self-loops + symmetric normalization into one matrix.
    a = jnp.zeros((N, N), jnp.float32).at[dst, src].add(1.0)
    nadj = gcn_normalized_adjacency(a)
    pool = sum_pool_matrix(batch, G)

    # GCNConv parameters (weight + bias per conv).
    w1, b1 = init_linear(k_w1, in_channels, hidden_channels)
    w2, b2 = init_linear(k_w2, hidden_channels, out_channels)

    ref = jax.block_until_ready(
        gcn_with_pooling_ref(nadj, pool, x0, w1, b1, w2, b2))

    # f32 adjacency path (exact at toy shapes).
    out = gcn_with_pooling_pallas(
        *prepare_inputs(nadj, pool, x0, w1, b1, w2, b2, adj_dtype=jnp.float32))
    out = jax.block_until_ready(out)
    np.testing.assert_allclose(np.asarray(out), np.asarray(ref),
                               rtol=2e-3, atol=2e-3)

    # bf16-adjacency path (what you'd run at non-toy N on v5e/v6e/v7x: halves
    # the HBM stream of the dominant nadj input; f32 accumulation kept).
    out_bf16 = gcn_with_pooling_pallas(
        *prepare_inputs(nadj, pool, x0, w1, b1, w2, b2, adj_dtype=jnp.bfloat16))
    out_bf16 = jax.block_until_ready(out_bf16)
    np.testing.assert_allclose(np.asarray(out_bf16), np.asarray(ref),
                               rtol=5e-2, atol=1e-1)

    assert out.shape == (G, out_channels) and out.dtype == jnp.float32
    print("KERNEL_OK")
</pallas_src>

<mosaic_0001>
module attributes {stable_mosaic.version = 11 : i64} {
  func.func @_fused_gcn_kernel(%arg0: i32, %arg1: i32, %arg2: memref<32x32xf32, #tpu.memory_space<vmem>>, %arg3: memref<32x8xf32, #tpu.memory_space<vmem>>, %arg4: memref<8x32xf32, #tpu.memory_space<vmem>>, %arg5: memref<1x32xf32, #tpu.memory_space<vmem>>, %arg6: memref<2x32xf32, #tpu.memory_space<vmem>>, %arg7: memref<32x8xf32, #tpu.memory_space<vmem>>, %arg8: memref<2x8xf32, #tpu.memory_space<vmem>>, %arg9: memref<2x8xf32, #tpu.memory_space<vmem>>, %arg10: memref<32x8xf32, #tpu.memory_space<vmem>>, %arg11: memref<2x32xf32, #tpu.memory_space<vmem>>) attributes {dimension_semantics = [#tpu.dimension_semantics<arbitrary>, #tpu.dimension_semantics<arbitrary>], iteration_bounds = array<i64: 1, 1>, scalar_prefetch = 0 : i64, scratch_operands = 2 : i64, tpu.core_type = #tpu.core_type<tc>, window_params = [{transform_indices = @transform_0, window_bounds = array<i64: 32, 32>}, {transform_indices = @transform_1, window_bounds = array<i64: 32, 8>}, {pipeline_mode = #tpu.pipeline_mode<synchronous>, transform_indices = @transform_2, window_bounds = array<i64: 8, 32>}, {pipeline_mode = #tpu.pipeline_mode<synchronous>, transform_indices = @transform_3, window_bounds = array<i64: 1, 32>}, {transform_indices = @transform_4, window_bounds = array<i64: 2, 32>}, {pipeline_mode = #tpu.pipeline_mode<synchronous>, transform_indices = @transform_5, window_bounds = array<i64: 32, 8>}, {pipeline_mode = #tpu.pipeline_mode<synchronous>, transform_indices = @transform_6, window_bounds = array<i64: 2, 8>}, {pipeline_mode = #tpu.pipeline_mode<synchronous>, transform_indices = @transform_7, window_bounds = array<i64: 2, 8>}]} {
    %c0_i32 = arith.constant 0 : i32
    %0 = arith.cmpi eq, %arg0, %c0_i32 : i32
    %c0_i32_0 = arith.constant 0 : i32
    %1 = arith.cmpi eq, %arg1, %c0_i32_0 : i32
    %2 = arith.andi %0, %1 : i1
    %3 = arith.extui %2 : i1 to i32
    %c0_i32_1 = arith.constant 0 : i32
    %4 = arith.cmpi ne, %3, %c0_i32_1 : i32
    scf.if %4 {
      %cst_16 = arith.constant 0.000000e+00 : f32
      %22 = vector.broadcast %cst_16 : f32 to vector<2x32xf32>
      %c0_17 = arith.constant 0 : index
      %c0_18 = arith.constant 0 : index
      %23 = vector.load %arg11[%c0_17, %c0_18] : memref<2x32xf32, #tpu.memory_space<vmem>>, vector<2x32xf32>
      tpu.vector_store %arg11[%c0_17, %c0_18], %22 {strides = array<i32>} : memref<2x32xf32, #tpu.memory_space<vmem>>, vector<2x32xf32>,
    } else {
    }
    %c0_i32_2 = arith.constant 0 : i32
    %5 = arith.cmpi eq, %arg1, %c0_i32_2 : i32
    %6 = arith.extui %5 : i1 to i32
    %c0_i32_3 = arith.constant 0 : i32
    %7 = arith.cmpi ne, %6, %c0_i32_3 : i32
    scf.if %7 {
      %cst_16 = arith.constant 0.000000e+00 : f32
      %22 = vector.broadcast %cst_16 : f32 to vector<32x8xf32>
      %c0_17 = arith.constant 0 : index
      %c0_18 = arith.constant 0 : index
      %23 = vector.load %arg10[%c0_17, %c0_18] : memref<32x8xf32, #tpu.memory_space<vmem>>, vector<32x8xf32>
      tpu.vector_store %arg10[%c0_17, %c0_18], %22 {strides = array<i32>} : memref<32x8xf32, #tpu.memory_space<vmem>>, vector<32x8xf32>,
    } else {
    }
    %c0 = arith.constant 0 : index
    %c0_4 = arith.constant 0 : index
    %8 = vector.load %arg10[%c0, %c0_4] : memref<32x8xf32, #tpu.memory_space<vmem>>, vector<32x8xf32>
    %c0_5 = arith.constant 0 : index
    %c0_6 = arith.constant 0 : index
    %9 = vector.load %arg2[%c0_5, %c0_6] : memref<32x32xf32, #tpu.memory_space<vmem>>, vector<32x32xf32>
    %c0_7 = arith.constant 0 : index
    %c0_8 = arith.constant 0 : index
    %10 = vector.load %arg3[%c0_7, %c0_8] : memref<32x8xf32, #tpu.memory_space<vmem>>, vector<32x8xf32>
    %cst = arith.constant dense<0.000000e+00> : vector<32x8xf32>
    %11 = tpu.matmul %9, %10, %cst {dimension_numbers = #tpu.dot_dimension_numbers<[1], [0], [0], [1], [0, 0, 1, 1], [], []>} : vector<32x32xf32>, vector<32x8xf32>, vector<32x8xf32> -> vector<32x8xf32>
    %12 = arith.addf %8, %11 : vector<32x8xf32>
    %c0_9 = arith.constant 0 : index
    %c0_10 = arith.constant 0 : index
    %13 = vector.load %arg10[%c0_9, %c0_10] : memref<32x8xf32, #tpu.memory_space<vmem>>, vector<32x8xf32>
    tpu.vector_store %arg10[%c0_9, %c0_10], %12 {strides = array<i32>} : memref<32x8xf32, #tpu.memory_space<vmem>>, vector<32x8xf32>,
    %c0_i32_11 = arith.constant 0 : i32
    %14 = arith.cmpi eq, %arg1, %c0_i32_11 : i32
    %15 = arith.extui %14 : i1 to i32
    %c0_i32_12 = arith.constant 0 : i32
    %16 = arith.cmpi ne, %15, %c0_i32_12 : i32
    scf.if %16 {
      %c0_16 = arith.constant 0 : index
      %c0_17 = arith.constant 0 : index
      %22 = vector.load %arg10[%c0_16, %c0_17] : memref<32x8xf32, #tpu.memory_space<vmem>>, vector<32x8xf32>
      %c0_18 = arith.constant 0 : index
      %c0_19 = arith.constant 0 : index
      %23 = vector.load %arg4[%c0_18, %c0_19] : memref<8x32xf32, #tpu.memory_space<vmem>>, vector<8x32xf32>
      %cst_20 = arith.constant dense<0.000000e+00> : vector<32x32xf32>
      %24 = tpu.matmul %22, %23, %cst_20 {dimension_numbers = #tpu.dot_dimension_numbers<[1], [0], [0], [1], [0, 0, 1, 1], [], []>} : vector<32x8xf32>, vector<8x32xf32>, vector<32x32xf32> -> vector<32x32xf32>
      %c0_21 = arith.constant 0 : index
      %c0_22 = arith.constant 0 : index
      %25 = vector.load %arg5[%c0_21, %c0_22] : memref<1x32xf32, #tpu.memory_space<vmem>>, vector<1x32xf32>
      %26 = vector.broadcast %25 : vector<1x32xf32> to vector<32x32xf32>
      %27 = arith.addf %24, %26 : vector<32x32xf32>
      %cst_23 = arith.constant 0.000000e+00 : f32
      %28 = vector.broadcast %cst_23 : f32 to vector<32x32xf32>
      %29 = arith.maximumf %27, %28 : vector<32x32xf32>
      %c0_24 = arith.constant 0 : index
      %c0_25 = arith.constant 0 : index
      %30 = vector.load %arg11[%c0_24, %c0_25] : memref<2x32xf32, #tpu.memory_space<vmem>>, vector<2x32xf32>
      %c0_26 = arith.constant 0 : index
      %c0_27 = arith.constant 0 : index
      %31 = vector.load %arg6[%c0_26, %c0_27] : memref<2x32xf32, #tpu.memory_space<vmem>>, vector<2x32xf32>
      %cst_28 = arith.constant dense<0.000000e+00> : vector<2x32xf32>
      %32 = tpu.matmul %31, %29, %cst_28 {dimension_numbers = #tpu.dot_dimension_numbers<[1], [0], [0], [1], [0, 0, 1, 1], [], []>} : vector<2x32xf32>, vector<32x32xf32>, vector<2x32xf32> -> vector<2x32xf32>
      %33 = arith.addf %30, %32 : vector<2x32xf32>
      %c0_29 = arith.constant 0 : index
      %c0_30 = arith.constant 0 : index
      %34 = vector.load %arg11[%c0_29, %c0_30] : memref<2x32xf32, #tpu.memory_space<vmem>>, vector<2x32xf32>
      tpu.vector_store %arg11[%c0_29, %c0_30], %33 {strides = array<i32>} : memref<2x32xf32, #tpu.memory_space<vmem>>, vector<2x32xf32>,
    } else {
    }
    %c0_i32_13 = arith.constant 0 : i32
    %17 = arith.cmpi eq, %arg0, %c0_i32_13 : i32
    %c0_i32_14 = arith.constant 0 : i32
    %18 = arith.cmpi eq, %arg1, %c0_i32_14 : i32
    %19 = arith.andi %17, %18 : i1
    %20 = arith.extui %19 : i1 to i32
    %c0_i32_15 = arith.constant 0 : i32
    %21 = arith.cmpi ne, %20, %c0_i32_15 : i32
    scf.if %21 {
      %c0_16 = arith.constant 0 : index
      %c0_17 = arith.constant 0 : index
      %22 = vector.load %arg11[%c0_16, %c0_17] : memref<2x32xf32, #tpu.memory_space<vmem>>, vector<2x32xf32>
      %c0_18 = arith.constant 0 : index
      %c0_19 = arith.constant 0 : index
      %23 = vector.load %arg7[%c0_18, %c0_19] : memref<32x8xf32, #tpu.memory_space<vmem>>, vector<32x8xf32>
      %cst_20 = arith.constant dense<0.000000e+00> : vector<2x8xf32>
      %24 = tpu.matmul %22, %23, %cst_20 {dimension_numbers = #tpu.dot_dimension_numbers<[1], [0], [0], [1], [0, 0, 1, 1], [], []>} : vector<2x32xf32>, vector<32x8xf32>, vector<2x8xf32> -> vector<2x8xf32>
      %c0_21 = arith.constant 0 : index
      %c0_22 = arith.constant 0 : index
      %25 = vector.load %arg8[%c0_21, %c0_22] : memref<2x8xf32, #tpu.memory_space<vmem>>, vector<2x8xf32>
      %26 = arith.addf %24, %25 : vector<2x8xf32>
      %c0_23 = arith.constant 0 : index
      %c0_24 = arith.constant 0 : index
      %27 = vector.load %arg9[%c0_23, %c0_24] : memref<2x8xf32, #tpu.memory_space<vmem>>, vector<2x8xf32>
      tpu.vector_store %arg9[%c0_23, %c0_24], %26 {strides = array<i32>} : memref<2x8xf32, #tpu.memory_space<vmem>>, vector<2x8xf32>,
    } else {
    }
    return
  }
  func.func @transform_0(%arg0: i32, %arg1: i32) -> (i32, i32) {
    %c0_i32 = arith.constant 0 : i32
    return %arg0, %arg1 : i32, i32
  }
  func.func @transform_1(%arg0: i32, %arg1: i32) -> (i32, i32) {
    %c0_i32 = arith.constant 0 : i32
    %c0_i32_0 = arith.constant 0 : i32
    return %arg1, %c0_i32 : i32, i32
  }
  func.func @transform_2(%arg0: i32, %arg1: i32) -> (i32, i32) {
    %c0_i32 = arith.constant 0 : i32
    %c0_i32_0 = arith.constant 0 : i32
    %c0_i32_1 = arith.constant 0 : i32
    return %c0_i32, %c0_i32_0 : i32, i32
  }
  func.func @transform_3(%arg0: i32, %arg1: i32) -> (i32, i32) {
    %c0_i32 = arith.constant 0 : i32
    %c0_i32_0 = arith.constant 0 : i32
    %c0_i32_1 = arith.constant 0 : i32
    return %c0_i32, %c0_i32_0 : i32, i32
  }
  func.func @transform_4(%arg0: i32, %arg1: i32) -> (i32, i32) {
    %c0_i32 = arith.constant 0 : i32
    %c0_i32_0 = arith.constant 0 : i32
    return %c0_i32, %arg0 : i32, i32
  }
  func.func @transform_5(%arg0: i32, %arg1: i32) -> (i32, i32) {
    %c0_i32 = arith.constant 0 : i32
    %c0_i32_0 = arith.constant 0 : i32
    %c0_i32_1 = arith.constant 0 : i32
    return %c0_i32, %c0_i32_0 : i32, i32
  }
  func.func @transform_6(%arg0: i32, %arg1: i32) -> (i32, i32) {
    %c0_i32 = arith.constant 0 : i32
    %c0_i32_0 = arith.constant 0 : i32
    %c0_i32_1 = arith.constant 0 : i32
    return %c0_i32, %c0_i32_0 : i32, i32
  }
  func.func @transform_7(%arg0: i32, %arg1: i32) -> (i32, i32) {
    %c0_i32 = arith.constant 0 : i32
    %c0_i32_0 = arith.constant 0 : i32
    %c0_i32_1 = arith.constant 0 : i32
    return %c0_i32, %c0_i32_0 : i32, i32
  }
}

</mosaic_0001>

<bundles_post_ra>
// kernel: tpu_custom_call.1
= control target key start
LH: loop header
LB: loop body
LE: loop exit
PB: predicated region body
PF: predicated region fallthrough
CT: control target
= control target key end

     0   :  { %vm55_vm0 = vcmask 261120   ;;  %vm38_vm1 = vcmask 64512   ;;  %v556_v3 = vmov 0.0   ;;  %s685_s0 = inlined_call_operand.vmem [shape: f32[32,32], index: 0, kind: input, shape index: {}]   ;;  %s686_s1 = inlined_call_operand.vmem [shape: f32[32,8], index: 1, kind: input, shape index: {}]   ;;  %s687_s2 = inlined_call_operand.vmem [shape: f32[8,32], index: 2, kind: input, shape index: {}]   ;;  %s688_s3 = inlined_call_operand.vmem [shape: f32[1,32], index: 3, kind: input, shape index: {}]   ;;  %s689_s4 = inlined_call_operand.vmem [shape: f32[2,32], index: 4, kind: input, shape index: {}]   ;;  %s690_s5 = inlined_call_operand.vmem [shape: f32[32,8], index: 5, kind: input, shape index: {}]   ;;  %s691_s6 = inlined_call_operand.vmem [shape: f32[2,8], index: 6, kind: input, shape index: {}]   ;;  %s692_s7 = inlined_call_operand.hbm [shape: f32[2,8], index: 7, kind: output, shape index: {}]  }
   0x1   :  { %v54_v0 = vld [vmem:[%s686_s1 + $0x18] sm:$0xff]  ;;  %v53_v1 = vld [vmem:[%s686_s1 + $0x10] sm:$0xff]  ;;  %v47_v2 = vld [vmem:[%s685_s0] sm:$0xff]  ;;  %40 = vst.msk [vmem:[#allocation2 + $0x8] sm:$0xff] %vm38_vm1, %v556_v3 }
   0x2   :  { %487 = vmatprep.subr.mxu0 %v54_v0  ;;  %39 = vst.msk [vmem:[#allocation2] sm:$0xff] %vm38_vm1, %v556_v3  ;;  %41 = vst.msk [vmem:[#allocation2 + $0x10] sm:$0xff] %vm38_vm1, %v556_v3  ;;  %v52_v4 = vld [vmem:[%s686_s1 + $0x8] sm:$0xff]  ;;  %495 = vmatprep.mubr.msk.f32.mxu0 %vm55_vm0, %v47_v2 }
   0x3   :  { %42 = vst.msk [vmem:[#allocation2 + $0x18] sm:$0xff] %vm38_vm1, %v556_v3  ;;  %488 = vmatpush3.msra.mxu0 %v54_v0 }
   0x4   :  { %12 = vsyncpa [#allocation5], 0  ;;  %489 = vmatprep.subr.mxu0 %v53_v1  ;;  %v51_v5 = vld [vmem:[%s686_s1] sm:$0xff]  ;;  %v48_v6 = vld [vmem:[%s685_s0 + $0x8] sm:$0xff]  ;;  %vm557_vm2 = vmmov 0   ;;  %vm33_vm3 = vcmask 254976  }
   0x5   :  { %490 = vmatpush3.msra.mxu0 %v53_v1  ;;  %v49_v7 = vld [vmem:[%s685_s0 + $0x10] sm:$0xff]  ;;  %v50_v8 = vld [vmem:[%s685_s0 + $0x18] sm:$0xff]  ;;  %v169_v9 = vld [vmem:[%s687_s2] sm:$0xff]  ;;  %34 = vst.msk [vmem:[#allocation3] sm:$0x3] %vm33_vm3, %v556_v3  ;;  %s558_s28 = smov [#allocation4]  }
   0x6   :  { %491 = vmatprep.subr.mxu0 %v52_v4  ;;  %501 = vmatprep.subr.mxu1 %v169_v9  ;;  %v457_v28 = vld [vmem:[%s688_s3] ss:$0 sm:$0xff]  ;;  %v362_v40 = vld [vmem:[%s690_s5 + $0x18] sm:$0xff]  ;;  %v361_v41 = vld [vmem:[%s690_s5 + $0x10] sm:$0xff]  ;;  %s445_s29 = sshll.u32 %s558_s28, 4  ;;  %vm437_vm4 = vcmask 58368   ;;  %s446_s29 = int_to_ptr.vmem [resolvable:$true] %s445_s29 }
   0x7   :  { %492 = vmatpush3.msra.mxu0 %v52_v4  ;;  %502 = vmatpush3.msra.mxu1 %v169_v9  ;;  %v279_v39 = vld [vmem:[%s689_s4] sm:$0x3]  ;;  %v360_v42 = vld [vmem:[%s690_s5 + $0x8] sm:$0xff]  ;;  %p539_p1 = scmp.lt.s32.totalorder %s446_s29, %s446_s29 }
   0x8   :  { %493 = vmatprep.subr.mxu0 %v51_v5  ;;  %509 = vmatprep.subr.mxu1 %v556_v3  ;;  %v44_v10 = vld [vmem:[#allocation2 + $0x8] sm:$0xff]  ;;  %v359_v43 = vld [vmem:[%s690_s5] sm:$0xff]  ;;  %s534_s5 = scalar_lea.vmem %s446_s29, 32 }
   0x9   :  { %494 = vmatpush3.msra.mxu0 %v51_v5  ;;  %v43_v12 = vld [vmem:[#allocation2] sm:$0xff]  ;;  %v45_v18 = vld [vmem:[#allocation2 + $0x10] sm:$0xff]  ;;  %p535_p0 = scmp.ne.s32.totalorder %s446_s29, %s534_s5  ;;  %p540_p2 = scmp.lt.s32.totalorder %s534_s5, %s534_s5 }
   0xa   :  { %496 = vmatmul.mubr.msk.f32.vlgmr.msra.gmra.mxu0 %vm55_vm0, %v48_v6  ;;  %520 = vmatprep.subr.mxu0 %v556_v3  ;;  %v46_v15 = vld [vmem:[#allocation2 + $0x18] sm:$0xff]  ;;  %v363_v49 = vld [vmem:[%s691_s6] sm:$0x3] }
   0xb   :  { %498 = vmatprep.mubr.msk.f32.mxu0 %vm55_vm0, %v49_v7  ;;  %521 = vmatpush3.msra.mxu0 %v362_v40  ;;  %p541_p3 = por %p540_p2, %p539_p1 }
   0xc   :  { %522 = vmatprep.subr.mxu0 %v556_v3  ;;  %v278_v44 = vld [vmem:[#allocation3] sm:$0x3] }
   0xd   :  { %523 = vmatpush3.msra.mxu0 %v361_v41  ;;  %p542_p4 = pnand %p541_p3, %p535_p0 }
   0xe   :  { %499 = vmatmul.mubr.msk.f32.gmra.mxu0 %vm55_vm0, %v50_v8  ;;  %524 = vmatprep.subr.mxu0 %v556_v3 }
   0xf   :  { %528 = vmatprep.mubr.msk.f32.mxu0 %vm557_vm2, %v556_v3  ;;  %525 = vmatpush3.msra.mxu0 %v360_v42 }
  0x10   :  { %526 = vmatprep.subr.mxu0 %v556_v3 }
  0x11   :  { %527 = vmatpush3.msra.mxu0 %v359_v43 }
  0xca   :  { %v497_v11 = vpop.f32.mrf.mxu0 }
  0xcb   :  { %v154_v13 = vadd.f32 %v497_v11, %v44_v10 }
  0xcc   :  { %v134_v14 = vpop.f32.mrf.mxu0 }
  0xcd   :  { %159 = vst.msk [vmem:[#allocation2 + $0x8] sm:$0xff] %vm38_vm1, %v154_v13  ;;  %v153_v16 = vadd.f32 %v134_v14, %v43_v12 }
  0xce   :  { %v500_v17 = vpop.f32.mrf.mxu0 }
  0xcf   :  { %158 = vst.msk [vmem:[#allocation2] sm:$0xff] %vm38_vm1, %v153_v16  ;;  %v156_v19 = vadd.f32 %v500_v17, %v46_v15 }
  0xd0   :  { %v144_v20 = vpop.f32.mrf.mxu0 }
  0xd1   :  { %161 = vst.msk [vmem:[#allocation2 + $0x18] sm:$0xff] %vm38_vm1, %v156_v19  ;;  %v155_v21 = vadd.f32 %v144_v20, %v45_v18 }
  0xd3   :  { %160 = vst.msk [vmem:[#allocation2 + $0x10] sm:$0xff] %vm38_vm1, %v155_v21 }
  0xd4   :  { %v166_v23 = vld [vmem:[#allocation2 + $0x8] sm:$0xff] }
  0xd6   :  { %v165_v22 = vld [vmem:[#allocation2] sm:$0xff] }
  0xd7   :  { %503 = vmatprep.mubr.msk.f32.mxu1 %vm38_vm1, %v165_v22 }
  0xd8   :  { %504 = vmatmul.mubr.msk.f32.vlgmr.msra.gmra.mxu1 %vm38_vm1, %v166_v23  ;;  %v168_v25 = vld [vmem:[#allocation2 + $0x18] sm:$0xff] }
  0xda   :  { %v167_v24 = vld [vmem:[#allocation2 + $0x10] sm:$0xff] }
  0xdb   :  { %506 = vmatprep.mubr.msk.f32.mxu1 %vm38_vm1, %v167_v24 }
  0xdc   :  { %507 = vmatmul.mubr.msk.f32.gmra.mxu1 %vm38_vm1, %v168_v25 }
  0xdd   :  { %517 = vmatprep.mubr.msk.f32.mxu1 %vm557_vm2, %v556_v3 }
 0x198   :  { %v505_v26 = vpop.f32.mrf.mxu1 }
 0x199   :  { %v261_v32 = vadd.f32 %v505_v26, %v457_v28 }
 0x19a   :  { %v255_v27 = vpop.f32.mrf.mxu1 }
 0x19b   :  { %v256_v35 = vadd.f32 %v457_v28, %v255_v27  ;;  %v275_v37 = vmax.f32 %v261_v32, 0.0 }
 0x19c   :  { %v508_v29 = vpop.f32.mrf.mxu1 }
 0x19d   :  { %v271_v30 = vadd.f32 %v508_v29, %v457_v28  ;;  %v274_v38 = vmax.f32 %v256_v35, 0.0 }
 0x19e   :  { %v265_v31 = vpop.f32.mrf.mxu1 }
 0x19f   :  { %v277_v33 = vmax.f32 %v271_v30, 0.0  ;;  %v266_v34 = vadd.f32 %v457_v28, %v265_v31 }
 0x1a1   :  { %v276_v36 = vmax.f32 %v266_v34, 0.0  ;;  %510 = vmatpush3.msra.mxu1 %v277_v33 }
 0x1a2   :  { %511 = vmatprep.subr.mxu1 %v556_v3 }
 0x1a3   :  { %512 = vmatpush3.msra.mxu1 %v276_v36 }
 0x1a4   :  { %513 = vmatprep.subr.mxu1 %v556_v3 }
 0x1a5   :  { %514 = vmatpush3.msra.mxu1 %v275_v37 }
 0x1a6   :  { %515 = vmatprep.subr.mxu1 %v556_v3 }
 0x1a7   :  { %516 = vmatpush3.msra.mxu1 %v274_v38 }
 0x1a8   :  { %518 = vmatmul.mubr.msk.f32.vlgmr.msra.gmra.mxu1 %vm55_vm0, %v279_v39 }
 0x268   :  { %v349_v45 = vpop.f32.mrf.mxu1 }
 0x269   :  { %v353_v46 = vadd.f32 %v349_v45, %v278_v44 }
 0x26a   :  { %v519_v47 = vpop.f32.mrf.mxu1 }
 0x26b   :  { %355 = vst.msk [vmem:[#allocation3] sm:$0x3] %vm33_vm3, %v353_v46 }
 0x272   :  { %v358_v48 = vld [vmem:[#allocation3] sm:$0x3] }
 0x273   :  { %529 = vmatmul.mubr.msk.f32.vlgmr.msra.gmra.mxu0 %vm55_vm0, %v358_v48 }
 0x333   :  { %v433_v50 = vpop.f32.mrf.mxu0 }
 0x334   :  { %v434_v51 = vadd.f32 %v433_v50, %v363_v49 }
 0x335   :  { %v530_v52 = vpop.f32.mrf.mxu0 }
 0x336   :  { %438 = vst.msk [vmem:[#allocation4] sm:$0x3] %vm437_vm4, %v434_v51 }
 0x337   :  { %545 = shalt.err (!%p542_p4)
}
 0x338   :  { %448 = dma.vmem_to_hbm [thread:$0]  %s446_s29, 32, %s692_s7, [#allocation5]  }
 0x339   :  { %554 = dma.done.wait [#allocation5], 32  }
 0x33a   :  { %555 = vsyncadd [#allocation5], 4294967264 }
 0x33b   :  { %452 = vsyncpa [#allocation5], 1 }

</bundles_post_ra>
